<compile_context>
chip_gen: v7x
topology: tpu7x:2x2x1
jax: 0.10.0
libtpu: 0.0.40
codegen_flags: <defaults>
</compile_context>

<pallas_src>
import functools

import jax
import jax.numpy as jnp
from jax.experimental import pallas as pl
from jax.experimental.pallas import tpu as pltpu

_LANES = 128
_SUBLANES = 8


def _slope_l1_kernel(x_ref, out_ref, acc_ref, *, scale, target_f32):
    # x_ref: (TR, 128) input tile in VMEM (any float dtype, upcast here).
    # acc_ref: (8, 128) f32 VMEM scratch of per-lane partial sums.
    # out_ref: (1, 1) f32 SMEM scalar (written once, on the last grid step).
    i = pl.program_id(0)

    @pl.when(i == 0)
    def _():
        acc_ref[...] = jnp.zeros_like(acc_ref)

    x = x_ref[...].astype(jnp.float32)            # (TR, 128)
    abs_err = jnp.abs(x - target_f32)             # VPU elementwise
    tr = abs_err.shape[0]
    # Fold rows into an (8, 128) per-lane partial: summing over axis 0 of
    # (TR//8, 8, 128) is pure vreg-wise VPU adds (no cross-lane XLU work).
    partial = abs_err.reshape(tr // _SUBLANES, _SUBLANES, _LANES).sum(axis=0)
    acc_ref[...] += partial

    @pl.when(i == pl.num_programs(0) - 1)
    def _():
        # Single cross-lane/sublane reduce of the (8,128) accumulator, then
        # one fused multiply by scale = loss_weight / n.
        out_ref[0, 0] = jnp.sum(acc_ref[...]) * scale


def slope_l1(preds, target=1.0, loss_weight=1.0, *, block_rows=2048,
             force_pallas=False):
    """preds: array whose flattened length is n (the concatenated scalar preds).

    target / loss_weight must be static Python numbers (matches the module,
    where target defaults to 1.0 and loss_weight is a ctor arg).
    """
    preds = jnp.ravel(preds)
    n = int(preds.shape[0])
    if n == 0:
        return jnp.float32(0.0)

    if n < 1024 and not force_pallas:
        # Tiny n: per-pallas_call overhead dwarfs the ~n VPU ops; let XLA fuse it.
        return (loss_weight *
                jnp.mean(jnp.abs(preds.astype(jnp.float32) - target))
                ).astype(jnp.float32)

    dtype = preds.dtype
    # Pad with the dtype-rounded target so padded elements contribute exactly
    # zero to the sum (the kernel subtracts the same rounded constant).
    t_cast = jnp.asarray(target, dtype=dtype)
    target_f32 = float(jnp.asarray(t_cast, dtype=jnp.float32))

    # Sublane-dense layout: rows of 128 lanes, rows a multiple of 8.
    rows = max(-(-n // _LANES), _SUBLANES)
    rows = ((rows + _SUBLANES - 1) // _SUBLANES) * _SUBLANES
    tr = max(_SUBLANES, (min(block_rows, rows) // _SUBLANES) * _SUBLANES)
    rows_total = ((rows + tr - 1) // tr) * tr
    n_padded = rows_total * _LANES

    pad = n_padded - n
    if pad:
        preds = jnp.concatenate(
            [preds, jnp.full((pad,), t_cast, dtype=dtype)])
    x2d = preds.reshape(rows_total, _LANES)

    scale = float(loss_weight) / float(n)   # divide by ORIGINAL n, not padded
    kernel = functools.partial(_slope_l1_kernel, scale=scale,
                               target_f32=target_f32)

    grid = (rows_total // tr,)
    out = pl.pallas_call(
        kernel,
        out_shape=jax.ShapeDtypeStruct((1, 1), jnp.float32),
        grid=grid,
        in_specs=[pl.BlockSpec((tr, _LANES), lambda i: (i, 0))],
        out_specs=pl.BlockSpec(memory_space=pltpu.MemorySpace.SMEM),
        scratch_shapes=[pltpu.VMEM((_SUBLANES, _LANES), jnp.float32)],
        compiler_params=pltpu.CompilerParams(
            dimension_semantics=("arbitrary",),   # reduction axis
            vmem_limit_bytes=32 << 20,            # safe on v5e/v6e/v7x
        ),
    )(x2d)
    return out[0, 0]


if __name__ == "__main__":
    key = jax.random.PRNGKey(0)

    # Case 1: matches the PyTorch module usage — a list of n=8 scalar preds.
    n_small = 8
    preds_list = [jax.random.normal(jax.random.fold_in(key, i), ())
                  for i in range(n_small)]
    preds_small = jnp.stack(preds_list)                       # shape (8,)
    loss_small = slope_l1(preds_small, target=1.0, loss_weight=1.0,
                          force_pallas=True)                  # exercise the kernel
    loss_small = jax.block_until_ready(loss_small)
    ref_small = 1.0 * jnp.mean(jnp.abs(preds_small.astype(jnp.float32) - 1.0))
    assert jnp.allclose(loss_small, ref_small, atol=1e-6, rtol=1e-6), (
        loss_small, ref_small)

    # Case 2: a larger vector with a tiny block size to exercise the
    # multi-block grid reduction / accumulator path (grid = (3,)).
    n_big = 3000
    preds_big = jax.random.normal(jax.random.fold_in(key, 123), (n_big,),
                                  dtype=jnp.float32)
    loss_big = slope_l1(preds_big, target=1.0, loss_weight=0.5,
                        block_rows=8, force_pallas=True)
    loss_big = jax.block_until_ready(loss_big)
    ref_big = 0.5 * jnp.mean(jnp.abs(preds_big - 1.0))
    assert jnp.allclose(loss_big, ref_big, atol=1e-5, rtol=1e-5), (
        loss_big, ref_big)

    print("KERNEL_OK")
</pallas_src>

<mosaic_0001>
module attributes {stable_mosaic.version = 11 : i64} {
  func.func @_slope_l1_kernel(%arg0: i32, %arg1: memref<8x128xf32, #tpu.memory_space<vmem>>, %arg2: memref<1x1xf32, #tpu.memory_space<smem>>, %arg3: memref<8x128xf32, #tpu.memory_space<vmem>>) attributes {dimension_semantics = [#tpu.dimension_semantics<arbitrary>], iteration_bounds = array<i64: 1>, scalar_prefetch = 0 : i64, scratch_operands = 1 : i64, tpu.core_type = #tpu.core_type<tc>, window_params = [{transform_indices = @transform_0, window_bounds = array<i64: 8, 128>}, {transform_indices = @transform_1, window_bounds = array<i64: 1, 1>}]} {
    %c0_i32 = arith.constant 0 : i32
    %0 = arith.cmpi eq, %arg0, %c0_i32 : i32
    %1 = arith.extui %0 : i1 to i32
    %c0_i32_0 = arith.constant 0 : i32
    %2 = arith.cmpi ne, %1, %c0_i32_0 : i32
    scf.if %2 {
      %cst_9 = arith.constant 0.000000e+00 : f32
      %15 = vector.broadcast %cst_9 : f32 to vector<8x128xf32>
      %c0_10 = arith.constant 0 : index
      %c0_11 = arith.constant 0 : index
      %16 = vector.load %arg3[%c0_10, %c0_11] : memref<8x128xf32, #tpu.memory_space<vmem>>, vector<8x128xf32>
      tpu.vector_store %arg3[%c0_10, %c0_11], %15 {strides = array<i32>} : memref<8x128xf32, #tpu.memory_space<vmem>>, vector<8x128xf32>,
    } else {
    }
    %c0 = arith.constant 0 : index
    %c0_1 = arith.constant 0 : index
    %3 = vector.load %arg1[%c0, %c0_1] : memref<8x128xf32, #tpu.memory_space<vmem>>, vector<8x128xf32>
    %cst = arith.constant 1.000000e+00 : f32
    %4 = vector.broadcast %cst : f32 to vector<8x128xf32>
    %5 = arith.subf %3, %4 : vector<8x128xf32>
    %6 = math.absf %5 : vector<8x128xf32>
    %7 = vector.shape_cast %6 : vector<8x128xf32> to vector<1x8x128xf32>
    %cst_2 = arith.constant dense<0.000000e+00> : vector<8x128xf32>
    %8 = vector.multi_reduction <add>, %7, %cst_2 [0] : vector<1x8x128xf32> to vector<8x128xf32>
    %c0_3 = arith.constant 0 : index
    %c0_4 = arith.constant 0 : index
    %9 = vector.load %arg3[%c0_3, %c0_4] : memref<8x128xf32, #tpu.memory_space<vmem>>, vector<8x128xf32>
    %10 = arith.addf %9, %8 : vector<8x128xf32>
    %c0_5 = arith.constant 0 : index
    %c0_6 = arith.constant 0 : index
    %11 = vector.load %arg3[%c0_5, %c0_6] : memref<8x128xf32, #tpu.memory_space<vmem>>, vector<8x128xf32>
    tpu.vector_store %arg3[%c0_5, %c0_6], %10 {strides = array<i32>} : memref<8x128xf32, #tpu.memory_space<vmem>>, vector<8x128xf32>,
    %c0_i32_7 = arith.constant 0 : i32
    %12 = arith.cmpi eq, %arg0, %c0_i32_7 : i32
    %13 = arith.extui %12 : i1 to i32
    %c0_i32_8 = arith.constant 0 : i32
    %14 = arith.cmpi ne, %13, %c0_i32_8 : i32
    scf.if %14 {
      %c0_9 = arith.constant 0 : index
      %c0_10 = arith.constant 0 : index
      %15 = vector.load %arg3[%c0_9, %c0_10] : memref<8x128xf32, #tpu.memory_space<vmem>>, vector<8x128xf32>
      %16 = vector.shape_cast %15 : vector<8x128xf32> to vector<1x8x128xf32>
      %cst_11 = arith.constant dense<0.000000e+00> : vector<1xf32>
      %17 = vector.multi_reduction <add>, %16, %cst_11 [1, 2] : vector<1x8x128xf32> to vector<1xf32>
      %18 = vector.shape_cast %17 : vector<1xf32> to vector<1x1x1xf32>
      %19 = vector.extract %18[0, 0, 0] : f32 from vector<1x1x1xf32>
      %cst_12 = arith.constant 1.250000e-01 : f32
      %20 = arith.mulf %19, %cst_12 : f32
      %c0_13 = arith.constant 0 : index
      %c0_14 = arith.constant 0 : index
      %21 = memref.load %arg2[%c0_13, %c0_14] : memref<1x1xf32, #tpu.memory_space<smem>>
      memref.store %20, %arg2[%c0_13, %c0_14] : memref<1x1xf32, #tpu.memory_space<smem>>
    } else {
    }
    return
  }
  func.func @transform_0(%arg0: i32) -> (i32, i32) {
    %c0_i32 = arith.constant 0 : i32
    %c0_i32_0 = arith.constant 0 : i32
    return %arg0, %c0_i32 : i32, i32
  }
  func.func @transform_1(%arg0: i32) -> (i32, i32) {
    %c0_i32 = arith.constant 0 : i32
    %c0_i32_0 = arith.constant 0 : i32
    %c0_i32_1 = arith.constant 0 : i32
    return %c0_i32, %c0_i32_0 : i32, i32
  }
}

</mosaic_0001>

<bundles_post_ra>
// kernel: tpu_custom_call.1
= control target key start
LH: loop header
LB: loop body
LE: loop exit
PB: predicated region body
PF: predicated region fallthrough
CT: control target
= control target key end

     0   :  { %6 = vsyncpa [#allocation4], 0  ;;  %s140_s0 = inlined_call_operand.hbm [shape: f32[8,128], index: 0, kind: input, shape index: {}]   ;;  %s141_s1 = inlined_call_operand.hbm [shape: f32[1,1], index: 1, kind: output, shape index: {}]  }
   0x1   :  { %7 = vsyncpa [#allocation5], 0  ;;  %s104_s6 = smov [#allocation3]   ;;  %s68_s10 = scalar_lea.hbm %s140_s0, 128 }
   0x2   :  { %s14_s7 = sshll.u32 %s104_s6, 4  ;;  %p69_p0 = scmp.ne.s32.totalorder %s140_s0, %s68_s10  ;;  %s15_s7 = int_to_ptr.vmem [resolvable:$true] %s14_s7 }
   0x3   :  { %p72_p1 = scmp.lt.u32.totalorder %s68_s10, %s140_s0 }
   0x5   :  { %p74_p2 = pnand %p72_p1, %p69_p0 }
   0x7   :  { %77 = shalt.err (!%p74_p2)
}
   0x8   :  { %s78_s15 = scalar_lea.vmem %s15_s7, 128  ;;  %p83_p4 = scmp.lt.s32.totalorder %s15_s7, %s15_s7 }
   0x9   :  { %p79_p3 = scmp.ne.s32.totalorder %s15_s7, %s78_s15  ;;  %p84_p5 = scmp.lt.s32.totalorder %s78_s15, %s78_s15 }
   0xb   :  { %p85_p6 = por %p84_p5, %p83_p4 }
   0xd   :  { %p86_p7 = pnand %p85_p6, %p79_p3 }
   0xf   :  { %89 = shalt.err (!%p86_p7)
}
  0x10   :  { %17 = dma.hbm_to_vmem [thread:$0]  %s140_s0, 128, %s15_s7, [#allocation4]  }
  0x11   :  { %100 = dma.done.wait [#allocation4], 128  }
  0x12   :  { %101 = vsyncadd [#allocation4], 4294967168  ;;  %v26_v0 = vld [vmem:[#allocation3] sm:$0xff]  ;;  %s90_s0 = scalar_lea.hbm %s141_s1, 16 }
  0x13   :  { %v63_v1 = vadd.f32 -1.0, %v26_v0  ;;  %p91_p8 = scmp.ne.s32.totalorder %s141_s1, %s90_s0  ;;  %p94_p9 = scmp.lt.u32.totalorder %s90_s0, %s141_s1 }
  0x15   :  { %v28_v2 = vand.u32 2147483647, %v63_v1  ;;  %p96_p10 = pnand %p94_p9, %p91_p8 }
  0x17   :  { %37 = vadd.xlane.f32.xlu0 %v28_v2 }
  0xa4   :  { %v38_v3 = vpop.xlane.xlu0 %37 }
  0xa5   :  { %v39_v4 = vrot.slane %v38_v3, 4 }
  0xa7   :  { %v40_v5 = vadd.f32 %v39_v4, %v38_v3 }
  0xa9   :  { %v41_v6 = vrot.slane %v40_v5, 2 }
  0xab   :  { %v42_v7 = vadd.f32 %v41_v6, %v40_v5 }
  0xad   :  { %v43_v8 = vrot.slane %v42_v7, 1 }
  0xaf   :  { %v44_v9 = vadd.f32 %v43_v8, %v42_v7 }
  0xb1   :  { %64 = vpush %v44_v9 }
  0xe2   :  { %s65_s18 = spop %64 }
  0xe3   :  { %s46_s19 = smul.f32 0.125, %s65_s18 }
  0xe5   :  { %48 = sst [smem:[#allocation6]] %s46_s19 }
  0xe6   :  { %99 = shalt.err (!%p96_p10)
}
  0xe7   :  { %s105_s26 = smov [#allocation6]  }
  0xe8   :  { %56 = dma.smem_to_hbm %s105_s26, 16, %s141_s1, [#allocation5]  }
  0xe9   :  { %102 = dma.done.wait [#allocation5], 16  }
  0xea   :  { %103 = vsyncadd [#allocation5], 4294967280 }
  0xeb   :  { %60 = sfence }
  0xec   :  { %61 = vsyncpa [#allocation4], 1 }
  0xed   :  { %62 = vsyncpa [#allocation5], 1 }

</bundles_post_ra>
